<compile_context>
chip_gen: v7x
topology: tpu7x:2x2x1
jax: 0.10.0
libtpu: 0.0.40
codegen_flags: <defaults>
</compile_context>

<pallas_src>
import jax
import jax.numpy as jnp
from jax.experimental import pallas as pl
from jax.experimental.pallas import tpu as pltpu


def _make_lconv_kernel(nb):
    def kernel(w_ref, b_ref, x_ref, o_ref):
        # w_ref: (C_out, C_in)   b_ref: (C_out, 1)   (bias in f32)
        # x_ref: (nb, C_in, TL)  o_ref: (nb, C_out, TL) -- spatial on lanes
        w = w_ref[...]
        b = b_ref[...]
        for i in range(nb):  # static unroll over the batch block
            acc = jnp.dot(w, x_ref[i], preferred_element_type=jnp.float32)
            acc = acc + b  # broadcast bias over lanes
            o_ref[i] = acc.astype(o_ref.dtype)

    return kernel


def _default_vmem_limit():
    """Generation-aware VMEM limit (~96 MiB on 128 MiB chips, ~48 MiB on v7x)."""
    try:
        cap = pltpu.get_tpu_info().vmem_capacity_bytes
    except Exception:
        cap = 64 * 1024 * 1024  # conservative fallback (v7x-sized)
    return int(0.75 * cap)


def lconv_forward(x_nchw, weight, bias, *, out_dtype=None, vmem_limit_bytes=None):
    """1x1 Conv2d forward (== PyTorch lconv.forward).

    x_nchw : (N, C_in, H, W)
    weight : (C_out, C_in, 1, 1)   (PyTorch Conv2d layout)
    bias   : (C_out,)
    out_dtype : optional output dtype (e.g. jnp.bfloat16 to halve writeback HBM
                traffic); defaults to x's dtype.
    returns: (N, C_out, H, W)
    """
    N, C_in, H, W = x_nchw.shape
    C_out = weight.shape[0]
    L = H * W
    if out_dtype is None:
        out_dtype = x_nchw.dtype

    # Free reshapes (no data movement): spatial goes on the lane (last) axis.
    x_view = x_nchw.reshape(N, C_in, L)
    w_mat = weight.reshape(C_out, C_in)
    b_col = bias.reshape(C_out, 1).astype(jnp.float32)

    in_bytes = jnp.dtype(x_view.dtype).itemsize
    out_bytes = jnp.dtype(out_dtype).itemsize

    if vmem_limit_bytes is None:
        vmem_limit_bytes = _default_vmem_limit()

    # --- choose the spatial (lane) tile size + batch block under VMEM budget --
    lane = 128
    L128 = pl.cdiv(L, lane) * lane

    # Every input/output block is double-buffered by the pipeline, including
    # the stationary weight/bias (hence the 2x on "fixed").
    fixed = 2 * (C_out * C_in * in_bytes + C_out * 4)
    budget = int(0.85 * vmem_limit_bytes) - fixed
    per_col = 2 * (C_in * in_bytes + C_out * out_bytes)  # per lane column, dbl-buffered
    tl_cap = max(lane, (budget // per_col) // lane * lane)
    tl = min(L128, tl_cap)              # collapse the L axis entirely if it fits
    num_l_tiles = pl.cdiv(L, tl)        # ragged trailing block handled by Pallas

    # Block several batch items per grid step to amortize per-step overhead.
    per_batch = 2 * tl * (C_in * in_bytes + C_out * out_bytes)
    nb_cap = max(1, budget // per_batch)
    nb = 1
    for cand in range(min(N, nb_cap, 8), 0, -1):
        if N % cand == 0:
            nb = cand
            break
    num_n_tiles = N // nb

    grid = (num_n_tiles, num_l_tiles)   # both parallel -> megacore sharding

    # NOTE: for very large channel counts (C_in/C_out >= 512) a C_in reduction
    # grid axis ("arbitrary", f32 accumulator + pl.when init/finalize) and a
    # C_out tile would be needed to keep the weight block inside v7x VMEM;
    # not exercised at these shapes.

    cost = pl.CostEstimate(
        flops=2 * N * L * C_in * C_out,
        transcendentals=0,
        bytes_accessed=(N * C_in * L * in_bytes
                        + C_out * C_in * in_bytes + C_out * 4
                        + N * C_out * L * out_bytes),
    )

    out_view = pl.pallas_call(
        _make_lconv_kernel(nb),
        out_shape=jax.ShapeDtypeStruct((N, C_out, L), out_dtype),
        grid_spec=pltpu.PrefetchScalarGridSpec(
            num_scalar_prefetch=0,
            grid=grid,
            in_specs=[
                pl.BlockSpec((C_out, C_in), lambda n, j: (0, 0)),       # weight
                pl.BlockSpec((C_out, 1), lambda n, j: (0, 0)),          # bias
                pl.BlockSpec((nb, C_in, tl), lambda n, j: (n, 0, j)),   # x
            ],
            out_specs=pl.BlockSpec((nb, C_out, tl), lambda n, j: (n, 0, j)),
        ),
        compiler_params=pltpu.CompilerParams(
            dimension_semantics=("parallel", "parallel"),
            vmem_limit_bytes=vmem_limit_bytes,
        ),
        cost_estimate=cost,
    )(w_mat, b_col, x_view)

    # Free reshape back to NCHW.
    return out_view.reshape(N, C_out, H, W)


def init_params(key, in_channel, out_channel, dtype=jnp.float32):
    # Deterministic synthetic init (mimics Conv2d param shapes).
    kw, kb = jax.random.split(key)
    fan_in = in_channel  # kernel_size=1
    bound = 1.0 / jnp.sqrt(fan_in)
    weight = jax.random.uniform(
        kw, (out_channel, in_channel, 1, 1), dtype, -bound, bound
    )
    bias = jax.random.uniform(kb, (out_channel,), dtype, -bound, bound)
    return weight, bias


def _ref_conv1x1(x, weight, bias):
    C_out = weight.shape[0]
    C_in = weight.shape[1]
    return (jnp.einsum("nchw,oc->nohw", x, weight.reshape(C_out, C_in))
            + bias[None, :, None, None])


if __name__ == "__main__":
    key = jax.random.PRNGKey(0)
    k_x, k_p, k_x2 = jax.random.split(key, 3)

    N, C_in, H, W = 2, 4, 16, 16
    C_out = 8

    x = jax.random.normal(k_x, (N, C_in, H, W), jnp.float32)
    weight, bias = init_params(k_p, C_in, C_out)

    # 1) f32 output path.
    out = lconv_forward(x, weight, bias)
    out = jax.block_until_ready(out)
    ref = _ref_conv1x1(x, weight, bias)
    assert out.shape == (N, C_out, H, W)
    assert jnp.allclose(out, ref, atol=1e-5, rtol=1e-5)

    # 2) bf16 output path (halved writeback traffic).
    out_bf16 = lconv_forward(x, weight, bias, out_dtype=jnp.bfloat16)
    out_bf16 = jax.block_until_ready(out_bf16)
    assert out_bf16.dtype == jnp.bfloat16
    assert jnp.allclose(out_bf16.astype(jnp.float32), ref, atol=5e-2, rtol=5e-2)

    # 3) ragged spatial extent (L not a multiple of 128): no pad / no slice,
    #    Pallas masks the trailing block's OOB output writes.
    H2, W2 = 16, 10   # L = 160
    x2 = jax.random.normal(k_x2, (1, C_in, H2, W2), jnp.float32)
    out2 = lconv_forward(x2, weight, bias)
    out2 = jax.block_until_ready(out2)
    ref2 = _ref_conv1x1(x2, weight, bias)
    assert out2.shape == (1, C_out, H2, W2)
    assert jnp.allclose(out2, ref2, atol=1e-5, rtol=1e-5)

    print("KERNEL_OK")
</pallas_src>

<mosaic_0001>
module attributes {stable_mosaic.version = 11 : i64} {
  func.func @kernel(%arg0: i32, %arg1: i32, %arg2: memref<8x4xf32, #tpu.memory_space<vmem>>, %arg3: memref<8x1xf32, #tpu.memory_space<vmem>>, %arg4: memref<2x4x256xf32, #tpu.memory_space<vmem>>, %arg5: memref<2x8x256xf32, #tpu.memory_space<vmem>>) attributes {dimension_semantics = [#tpu.dimension_semantics<parallel>, #tpu.dimension_semantics<parallel>], iteration_bounds = array<i64: 1, 1>, scalar_prefetch = 0 : i64, scratch_operands = 0 : i64, tpu.core_type = #tpu.core_type<tc>, window_params = [{pipeline_mode = #tpu.pipeline_mode<synchronous>, transform_indices = @transform_0, window_bounds = array<i64: 8, 4>}, {pipeline_mode = #tpu.pipeline_mode<synchronous>, transform_indices = @transform_1, window_bounds = array<i64: 8, 1>}, {transform_indices = @transform_2, window_bounds = array<i64: 2, 4, 256>}, {transform_indices = @transform_3, window_bounds = array<i64: 2, 8, 256>}]} {
    %c0 = arith.constant 0 : index
    %c0_0 = arith.constant 0 : index
    %0 = vector.load %arg2[%c0, %c0_0] : memref<8x4xf32, #tpu.memory_space<vmem>>, vector<8x4xf32>
    %c0_1 = arith.constant 0 : index
    %c0_2 = arith.constant 0 : index
    %1 = vector.load %arg3[%c0_1, %c0_2] : memref<8x1xf32, #tpu.memory_space<vmem>>, vector<8x1xf32>
    %c0_3 = arith.constant 0 : index
    %c0_4 = arith.constant 0 : index
    %c0_5 = arith.constant 0 : index
    %2 = vector.load %arg4[%c0_3, %c0_4, %c0_5] : memref<2x4x256xf32, #tpu.memory_space<vmem>>, vector<1x4x256xf32>
    %3 = vector.shape_cast %2 : vector<1x4x256xf32> to vector<4x256xf32>
    %cst = arith.constant dense<0.000000e+00> : vector<8x256xf32>
    %4 = tpu.matmul %0, %3, %cst {dimension_numbers = #tpu.dot_dimension_numbers<[1], [0], [0], [1], [0, 0, 1, 1], [], []>} : vector<8x4xf32>, vector<4x256xf32>, vector<8x256xf32> -> vector<8x256xf32>
    %5 = vector.broadcast %1 : vector<8x1xf32> to vector<8x256xf32>
    %6 = arith.addf %4, %5 : vector<8x256xf32>
    %c0_6 = arith.constant 0 : index
    %c0_7 = arith.constant 0 : index
    %c0_8 = arith.constant 0 : index
    %7 = vector.load %arg5[%c0_6, %c0_7, %c0_8] : memref<2x8x256xf32, #tpu.memory_space<vmem>>, vector<1x8x256xf32>
    %8 = vector.shape_cast %7 : vector<1x8x256xf32> to vector<8x256xf32>
    %9 = vector.shape_cast %6 : vector<8x256xf32> to vector<1x8x256xf32>
    tpu.vector_store %arg5[%c0_6, %c0_7, %c0_8], %9 {strides = array<i32>} : memref<2x8x256xf32, #tpu.memory_space<vmem>>, vector<1x8x256xf32>,
    %c1 = arith.constant 1 : index
    %c0_9 = arith.constant 0 : index
    %c0_10 = arith.constant 0 : index
    %10 = vector.load %arg4[%c1, %c0_9, %c0_10] : memref<2x4x256xf32, #tpu.memory_space<vmem>>, vector<1x4x256xf32>
    %11 = vector.shape_cast %10 : vector<1x4x256xf32> to vector<4x256xf32>
    %cst_11 = arith.constant dense<0.000000e+00> : vector<8x256xf32>
    %12 = tpu.matmul %0, %11, %cst_11 {dimension_numbers = #tpu.dot_dimension_numbers<[1], [0], [0], [1], [0, 0, 1, 1], [], []>} : vector<8x4xf32>, vector<4x256xf32>, vector<8x256xf32> -> vector<8x256xf32>
    %13 = vector.broadcast %1 : vector<8x1xf32> to vector<8x256xf32>
    %14 = arith.addf %12, %13 : vector<8x256xf32>
    %c1_12 = arith.constant 1 : index
    %c0_13 = arith.constant 0 : index
    %c0_14 = arith.constant 0 : index
    %15 = vector.load %arg5[%c1_12, %c0_13, %c0_14] : memref<2x8x256xf32, #tpu.memory_space<vmem>>, vector<1x8x256xf32>
    %16 = vector.shape_cast %15 : vector<1x8x256xf32> to vector<8x256xf32>
    %17 = vector.shape_cast %14 : vector<8x256xf32> to vector<1x8x256xf32>
    tpu.vector_store %arg5[%c1_12, %c0_13, %c0_14], %17 {strides = array<i32>} : memref<2x8x256xf32, #tpu.memory_space<vmem>>, vector<1x8x256xf32>,
    return
  }
  func.func @transform_0(%arg0: i32, %arg1: i32) -> (i32, i32) {
    %c0_i32 = arith.constant 0 : i32
    %c0_i32_0 = arith.constant 0 : i32
    %c0_i32_1 = arith.constant 0 : i32
    return %c0_i32, %c0_i32_0 : i32, i32
  }
  func.func @transform_1(%arg0: i32, %arg1: i32) -> (i32, i32) {
    %c0_i32 = arith.constant 0 : i32
    %c0_i32_0 = arith.constant 0 : i32
    %c0_i32_1 = arith.constant 0 : i32
    return %c0_i32, %c0_i32_0 : i32, i32
  }
  func.func @transform_2(%arg0: i32, %arg1: i32) -> (i32, i32, i32) {
    %c0_i32 = arith.constant 0 : i32
    %c0_i32_0 = arith.constant 0 : i32
    return %arg0, %c0_i32, %arg1 : i32, i32, i32
  }
  func.func @transform_3(%arg0: i32, %arg1: i32) -> (i32, i32, i32) {
    %c0_i32 = arith.constant 0 : i32
    %c0_i32_0 = arith.constant 0 : i32
    return %arg0, %c0_i32, %arg1 : i32, i32, i32
  }
}

</mosaic_0001>

<bundles_post_ra>
// kernel: tpu_custom_call.1
= control target key start
LH: loop header
LB: loop body
LE: loop exit
PB: predicated region body
PF: predicated region fallthrough
CT: control target
= control target key end

     0   :  { %vm29_vm0 = vcmask 1043456   ;;  %v244_v4 = vmov 0.0   ;;  %s297_s0 = inlined_call_operand.vmem [shape: f32[8,4], index: 0, kind: input, shape index: {}]   ;;  %s298_s1 = inlined_call_operand.vmem [shape: f32[8,1], index: 1, kind: input, shape index: {}]   ;;  %s299_s2 = inlined_call_operand.vmem [shape: f32[2,4,256], index: 2, kind: input, shape index: {}]   ;;  %s300_s3 = inlined_call_operand.hbm [shape: f32[2,8,256], index: 3, kind: output, shape index: {}]  }
   0x1   :  { %v17_v0 = vld [vmem:[%s299_s2] sm:$0xff]  ;;  %v208_v1 = vld [vmem:[%s299_s2 + $0x8] sm:$0xff]  ;;  %98 = vmatprep.mubr.f32.mxu0 %v244_v4  ;;  %179 = vmatprep.mubr.f32.mxu1 %v244_v4 }
   0x2   :  { %v24_v2 = vcombine.high %v17_v0, %v17_v0  ;;  %v110_v3 = vcombine.high %v208_v1, %v208_v1 }
   0x3   :  { %8 = vsyncpa [#allocation3], 0  ;;  %v15_v5 = vld [vmem:[%s297_s0] sm:$0xff]  ;;  %vm25_vm1 = vcmask 31744   ;;  %v245_v6 = vmov 0   ;;  %s246_s0 = smov [#allocation2]  }
   0x4   :  { %217 = vset.pattern.permute.xlu0 %v245_v6  ;;  %205 = vmatprep.subr.msk.mxu0 %vm29_vm0, %v24_v2  ;;  %v16_v7 = vld [vmem:[%s298_s1] sm:$0xff]  ;;  %s194_s2 = sshll.u32 %s246_s0, 4  ;;  %s195_s2 = int_to_ptr.vmem [resolvable:$true] %s194_s2 }
   0x5   :  { %209 = vmatprep.subr.msk.mxu1 %vm29_vm0, %v110_v3  ;;  %206 = vmatpush1.msk.msra.mxu0 %vm29_vm0, %v17_v0  ;;  %s220_s1 = scalar_lea.vmem %s195_s2, 512  ;;  %p225_p1 = scmp.lt.s32.totalorder %s195_s2, %s195_s2 }
   0x6   :  { %210 = vmatpush1.msk.msra.mxu1 %vm29_vm0, %v208_v1  ;;  %207 = vmatmul.mubr.msk.f32.vlgmr.msra.gmra.mrb[0].mxu0 %vm25_vm1, %v15_v5  ;;  %p221_p0 = scmp.ne.s32.totalorder %s195_s2, %s220_s1  ;;  %p226_p2 = scmp.lt.s32.totalorder %s220_s1, %s220_s1 }
   0x7   :  { %211 = vmatmul.mubr.msk.f32.vlgmr.msra.gmra.mrb[0].mxu1 %vm25_vm1, %v15_v5  ;;  %20 = vperm.xlu0 %217, %v16_v7  }
   0x8   :  { %p227_p3 = por %p226_p2, %p225_p1 }
   0xa   :  { %p228_p4 = pnand %p227_p3, %p221_p0 }
  0x86   :  { %v21_v8 = vpop.permute.xlu0 %20 }
  0xd9   :  { %v100_v9 = vpop.f32.mrb[0].mxu0 }
  0xda   :  { %v181_v10 = vpop.f32.mrb[0].mxu1  ;;  %v101_v11 = vadd.f32 %v100_v9, %v21_v8  ;;  %v102_v13 = vpop.f32.mrb[1].mxu0 }
  0xdb   :  { %v182_v12 = vadd.f32 %v181_v10, %v21_v8  ;;  %v183_v14 = vpop.f32.mrb[1].mxu1  ;;  %v103_v15 = vadd.f32 %v102_v13, %v21_v8 }
  0xdc   :  { %v184_v16 = vadd.f32 %v183_v14, %v21_v8  ;;  %105 = vst [vmem:[#allocation2] sm:$0xff] %v101_v11 }
  0xdd   :  { %187 = vst [vmem:[#allocation2 + $0x10] sm:$0xff] %v182_v12  ;;  %106 = vst [vmem:[#allocation2 + $0x8] sm:$0xff] %v103_v15 }
  0xde   :  { %188 = vst [vmem:[#allocation2 + $0x18] sm:$0xff] %v184_v16 }
  0xdf   :  { %231 = shalt.err (!%p228_p4)
}
  0xe0   :  { %s232_s22 = scalar_lea.hbm %s300_s3, 512 }
  0xe1   :  { %p233_p5 = scmp.ne.s32.totalorder %s300_s3, %s232_s22  ;;  %p236_p6 = scmp.lt.u32.totalorder %s232_s22, %s300_s3 }
  0xe3   :  { %p238_p7 = pnand %p236_p6, %p233_p5 }
  0xe5   :  { %241 = shalt.err (!%p238_p7)
}
  0xe6   :  { %s247_s27 = smov 256   ;;  %s248_s28 = smov 16  }
  0xe7   :  { %200 = dma.vmem_to_hbm [thread:$0]  %s195_s2, 512, %s300_s3, [#allocation3], %s247_s27, %s247_s27, %s248_s28  }
  0xe8   :  { %242 = dma.done.wait [#allocation3], 512  }
  0xe9   :  { %243 = vsyncadd [#allocation3], 4294966784 }
  0xea   :  { %204 = vsyncpa [#allocation3], 1 }

</bundles_post_ra>
